<compile_context>
chip_gen: v5e
topology: v5e:2x2
jax: 0.10.0
libtpu: 0.0.40
codegen_flags: <defaults>
</compile_context>

<pallas_src>
import jax
import jax.numpy as jnp
import numpy as np
from jax.experimental import pallas as pl
from jax.experimental.pallas import tpu as pltpu


# ----------------------------------------------------------------------------
# Kernel
# ----------------------------------------------------------------------------
def _han_semantic_kernel(z_ref, w1_ref, b1_ref, w2_ref, o_ref):
    """z_ref: (tn, M*D) flattened, w1_ref: (D, H), b1_ref: (1, H), w2_ref: (1, H).

    One fused pass: per-metapath projection (MXU) + tanh (EUP) + H->1 score
    (VPU mul + lane reduce), softmax over the M score columns, and the
    beta-weighted sum back to a (tn, D) output.  M is tiny and static, so the
    metapath loop is a plain Python unroll.
    """
    tn, MD = z_ref.shape
    D, H = w1_ref.shape
    M = MD // D

    w1 = w1_ref[...]                               # (D, H), fed straight to MXU
    b1 = b1_ref[...].astype(jnp.float32)           # (1, H)
    w2 = w2_ref[...].astype(jnp.float32)           # (1, H)  (row form of (H, 1))

    # --- per-metapath z slices (static lane slices of the flattened block)
    zs = [z_ref[:, m * D:(m + 1) * D] for m in range(M)]          # each (tn, D)

    # --- projection scores, one (tn, 1) column per metapath
    scores = []
    for zm in zs:
        h = jnp.tanh(
            jnp.dot(zm, w1, preferred_element_type=jnp.float32) + b1
        )                                                          # (tn, H) f32
        # second Linear (H -> 1, no bias): VPU mul + lane reduce (no 1-wide MXU)
        scores.append(jnp.sum(h * w2, axis=-1, keepdims=True))     # (tn, 1)

    # --- softmax over M, all on (tn, 1) columns (pure VPU / EUP work)
    m_max = scores[0]
    for m in range(1, M):
        m_max = jnp.maximum(m_max, scores[m])
    exps = [jnp.exp(s - m_max) for s in scores]
    denom = exps[0]
    for m in range(1, M):
        denom = denom + exps[m]
    inv_denom = pl.reciprocal(denom, approx=True)                  # EUP slot

    # --- weighted sum over M: plain (tn, D) FMAs on the z lane-slices
    acc = (exps[0] * inv_denom) * zs[0].astype(jnp.float32)
    for m in range(1, M):
        acc = acc + (exps[m] * inv_denom) * zs[m].astype(jnp.float32)

    o_ref[...] = acc.astype(o_ref.dtype)


# ----------------------------------------------------------------------------
# Tiling / VMEM sizing helpers
# ----------------------------------------------------------------------------
def _round_up(x: int, m: int) -> int:
    return ((x + m - 1) // m) * m


def _lane_pad(x: int) -> int:
    return _round_up(max(x, 1), 128)


def _vmem_bytes(tile_n, M, D, H, z_itemsize):
    """Rough VMEM budget for one grid step (lane-padded, double-buffered blocks)."""
    md_p, d_p, h_p = _lane_pad(M * D), _lane_pad(D), _lane_pad(H)
    return (2 * tile_n * md_p * z_itemsize          # double-buffered z block
            + 2 * tile_n * d_p * z_itemsize         # double-buffered output block
            + tile_n * (h_p + d_p + (M + 4) * 128) * 4   # f32 intermediates
            + (D * h_p + 2 * h_p) * 4)              # weights


def _choose_tile_n(N, M, D, H, z_itemsize, requested=None,
                   vmem_target=32 << 20):
    """Largest node tile (multiple of 8) that fits the VMEM target."""
    n8 = _round_up(max(N, 8), 8)
    tile = requested if requested is not None else 2048
    tile = max(8, (min(tile, n8) // 8) * 8)
    while tile > 8 and _vmem_bytes(tile, M, D, H, z_itemsize) > vmem_target:
        tile = max(8, (tile // 2 // 8) * 8)
    # keep >= 2 grid steps where possible so v7x's 2 TensorCores both get work
    if _round_up(N, tile) // tile < 2 and tile > 8:
        tile = max(8, (tile // 2 // 8) * 8)
    return tile


# ----------------------------------------------------------------------------
# Wrapper
# ----------------------------------------------------------------------------
def han_semantic_attn(z, w1, b1, w2, *, tile_n=None, vmem_target_bytes=32 << 20):
    """z: (N, M, D); w1: (D, H); b1: (H,); w2: (H, 1).  Returns (N, D)."""
    N, M, D = z.shape
    H = w1.shape[1]
    z_itemsize = jnp.dtype(z.dtype).itemsize

    tile = _choose_tile_n(N, M, D, H, z_itemsize, requested=tile_n,
                          vmem_target=vmem_target_bytes)

    # Flatten (N, M, D) -> (N, M*D): free for contiguous row-major z, and it
    # gives the kernel a plain 2-D block instead of a badly-padded 3-D one.
    z_flat = z.reshape(N, M * D)

    # Pad N to a multiple of the tile (padded rows are sliced off afterwards;
    # softmax over constant scores stays finite, so no NaN hazard).
    n_pad = _round_up(N, tile)
    if n_pad != N:
        z_flat = jnp.pad(z_flat, ((0, n_pad - N), (0, 0)))

    budget = _vmem_bytes(tile, M, D, H, z_itemsize)
    # Raise the scoped-VMEM limit past v5e's 16 MiB default, but stay well
    # inside v7x's 64 MiB physical VMEM.
    vmem_limit = int(min(max(2 * budget, 32 << 20), 48 << 20))

    b1_2d = b1.reshape(1, H)
    w2_row = w2.reshape(1, H)   # (H, 1) column -> (1, H) row for the VPU path

    out = pl.pallas_call(
        _han_semantic_kernel,
        out_shape=jax.ShapeDtypeStruct((n_pad, D), z.dtype),
        grid_spec=pltpu.PrefetchScalarGridSpec(
            num_scalar_prefetch=0,
            grid=(n_pad // tile,),
            in_specs=[
                pl.BlockSpec((tile, M * D), lambda i: (i, 0)),
                pl.BlockSpec((D, H), lambda i: (0, 0)),
                pl.BlockSpec((1, H), lambda i: (0, 0)),
                pl.BlockSpec((1, H), lambda i: (0, 0)),
            ],
            out_specs=pl.BlockSpec((tile, D), lambda i: (i, 0)),
        ),
        compiler_params=pltpu.CompilerParams(
            dimension_semantics=("parallel",),
            vmem_limit_bytes=vmem_limit,
        ),
    )(z_flat, w1, b1_2d, w2_row)
    return out[:N]


# ----------------------------------------------------------------------------
# Init + pure-JAX reference (mirrors the PyTorch HANSemanticAttnLayer.forward)
# ----------------------------------------------------------------------------
def _xavier_normal(key, shape, gain):
    fan_in, fan_out = shape[0], shape[1]
    std = gain * np.sqrt(2.0 / (fan_in + fan_out))
    return std * jax.random.normal(key, shape, dtype=jnp.float32)


def _reference(z, w1, b1, w2):
    w = jnp.tanh(jnp.einsum("nmd,dh->nmh", z, w1) + b1)      # (N, M, H)
    w = jnp.einsum("nmh,ho->nmo", w, w2)                     # (N, M, 1)
    beta = jax.nn.softmax(w, axis=1)
    return jnp.sum(beta * z, axis=1)


if __name__ == "__main__":
    key = jax.random.PRNGKey(0)
    k_z, k_w1, k_w2 = jax.random.split(key, 3)

    # Shapes consistent with CGMSHANLayer: each destination type stacks M=2
    # semantic embeddings of size dim_out * n_head = 8 * 4 = 32; the semantic
    # attention hidden dim is 256.  N=13 deliberately exercises the tail-pad path.
    N, M, D, H = 13, 2, 32, 256
    z = jax.random.normal(k_z, (N, M, D), dtype=jnp.float32)

    gain = np.sqrt(2.0)  # nn.init.calculate_gain('relu')
    # Weights built directly in (in, out) layout; xavier std is symmetric in
    # fan_in/fan_out so this matches the PyTorch (out, in) init distribution.
    w1 = _xavier_normal(k_w1, (D, H), gain)     # first Linear weight (D -> H)
    b1 = jnp.zeros((H,), dtype=jnp.float32)     # first Linear bias (zeros)
    w2 = _xavier_normal(k_w2, (H, 1), gain)     # second Linear (H -> 1), no bias

    out = han_semantic_attn(z, w1, b1, w2)
    out = jax.block_until_ready(out)

    ref = _reference(z, w1, b1, w2)
    # approx reciprocal in the softmax denominator -> slightly looser tolerance
    np.testing.assert_allclose(np.asarray(out), np.asarray(ref),
                               rtol=2e-3, atol=2e-3)

    print("KERNEL_OK")
</pallas_src>

<mosaic_0001>
module attributes {stable_mosaic.version = 11 : i64} {
  func.func @_han_semantic_kernel(%arg0: i32, %arg1: memref<8x64xf32, #tpu.memory_space<vmem>>, %arg2: memref<32x256xf32, #tpu.memory_space<vmem>>, %arg3: memref<1x256xf32, #tpu.memory_space<vmem>>, %arg4: memref<1x256xf32, #tpu.memory_space<vmem>>, %arg5: memref<8x32xf32, #tpu.memory_space<vmem>>) attributes {dimension_semantics = [#tpu.dimension_semantics<parallel>], iteration_bounds = array<i64: 2>, scalar_prefetch = 0 : i64, scratch_operands = 0 : i64, tpu.core_type = #tpu.core_type<tc>, window_params = [{transform_indices = @transform_0, window_bounds = array<i64: 8, 64>}, {pipeline_mode = #tpu.pipeline_mode<synchronous>, transform_indices = @transform_1, window_bounds = array<i64: 32, 256>}, {pipeline_mode = #tpu.pipeline_mode<synchronous>, transform_indices = @transform_2, window_bounds = array<i64: 1, 256>}, {pipeline_mode = #tpu.pipeline_mode<synchronous>, transform_indices = @transform_3, window_bounds = array<i64: 1, 256>}, {transform_indices = @transform_4, window_bounds = array<i64: 8, 32>}]} {
    %c0 = arith.constant 0 : index
    %c0_0 = arith.constant 0 : index
    %0 = vector.load %arg2[%c0, %c0_0] : memref<32x256xf32, #tpu.memory_space<vmem>>, vector<32x256xf32>
    %c0_1 = arith.constant 0 : index
    %c0_2 = arith.constant 0 : index
    %1 = vector.load %arg3[%c0_1, %c0_2] : memref<1x256xf32, #tpu.memory_space<vmem>>, vector<1x256xf32>
    %c0_3 = arith.constant 0 : index
    %c0_4 = arith.constant 0 : index
    %2 = vector.load %arg4[%c0_3, %c0_4] : memref<1x256xf32, #tpu.memory_space<vmem>>, vector<1x256xf32>
    %c0_5 = arith.constant 0 : index
    %c0_6 = arith.constant 0 : index
    %3 = vector.load %arg1[%c0_5, %c0_6] : memref<8x64xf32, #tpu.memory_space<vmem>>, vector<8x32xf32>
    %c0_7 = arith.constant 0 : index
    %c32 = arith.constant 32 : index
    %4 = vector.load %arg1[%c0_7, %c32] : memref<8x64xf32, #tpu.memory_space<vmem>>, vector<8x32xf32>
    %cst = arith.constant dense<0.000000e+00> : vector<8x256xf32>
    %5 = tpu.matmul %3, %0, %cst {dimension_numbers = #tpu.dot_dimension_numbers<[1], [0], [0], [1], [0, 0, 1, 1], [], []>} : vector<8x32xf32>, vector<32x256xf32>, vector<8x256xf32> -> vector<8x256xf32>
    %6 = vector.broadcast %1 : vector<1x256xf32> to vector<8x256xf32>
    %7 = arith.addf %5, %6 : vector<8x256xf32>
    %8 = math.tanh %7 : vector<8x256xf32>
    %9 = vector.broadcast %2 : vector<1x256xf32> to vector<8x256xf32>
    %10 = arith.mulf %8, %9 : vector<8x256xf32>
    %cst_8 = arith.constant dense<0.000000e+00> : vector<8xf32>
    %11 = vector.multi_reduction <add>, %10, %cst_8 [1] : vector<8x256xf32> to vector<8xf32>
    %12 = vector.shape_cast %11 : vector<8xf32> to vector<8x1xf32>
    %cst_9 = arith.constant dense<0.000000e+00> : vector<8x256xf32>
    %13 = tpu.matmul %4, %0, %cst_9 {dimension_numbers = #tpu.dot_dimension_numbers<[1], [0], [0], [1], [0, 0, 1, 1], [], []>} : vector<8x32xf32>, vector<32x256xf32>, vector<8x256xf32> -> vector<8x256xf32>
    %14 = vector.broadcast %1 : vector<1x256xf32> to vector<8x256xf32>
    %15 = arith.addf %13, %14 : vector<8x256xf32>
    %16 = math.tanh %15 : vector<8x256xf32>
    %17 = vector.broadcast %2 : vector<1x256xf32> to vector<8x256xf32>
    %18 = arith.mulf %16, %17 : vector<8x256xf32>
    %cst_10 = arith.constant dense<0.000000e+00> : vector<8xf32>
    %19 = vector.multi_reduction <add>, %18, %cst_10 [1] : vector<8x256xf32> to vector<8xf32>
    %20 = vector.shape_cast %19 : vector<8xf32> to vector<8x1xf32>
    %21 = arith.maximumf %12, %20 : vector<8x1xf32>
    %22 = arith.subf %12, %21 : vector<8x1xf32>
    %23 = math.exp %22 : vector<8x1xf32>
    %24 = arith.subf %20, %21 : vector<8x1xf32>
    %25 = math.exp %24 : vector<8x1xf32>
    %26 = arith.addf %23, %25 : vector<8x1xf32>
    %27 = tpu.reciprocal %26 {approx = true} : vector<8x1xf32> -> vector<8x1xf32>
    %28 = arith.mulf %23, %27 : vector<8x1xf32>
    %29 = vector.broadcast %28 : vector<8x1xf32> to vector<8x32xf32>
    %30 = arith.mulf %29, %3 : vector<8x32xf32>
    %31 = arith.mulf %25, %27 : vector<8x1xf32>
    %32 = vector.broadcast %31 : vector<8x1xf32> to vector<8x32xf32>
    %33 = arith.mulf %32, %4 : vector<8x32xf32>
    %34 = arith.addf %30, %33 : vector<8x32xf32>
    %c0_11 = arith.constant 0 : index
    %c0_12 = arith.constant 0 : index
    %35 = vector.load %arg5[%c0_11, %c0_12] : memref<8x32xf32, #tpu.memory_space<vmem>>, vector<8x32xf32>
    tpu.vector_store %arg5[%c0_11, %c0_12], %34 {strides = array<i32>} : memref<8x32xf32, #tpu.memory_space<vmem>>, vector<8x32xf32>,
    return
  }
  func.func @transform_0(%arg0: i32) -> (i32, i32) {
    %c0_i32 = arith.constant 0 : i32
    %c0_i32_0 = arith.constant 0 : i32
    return %arg0, %c0_i32 : i32, i32
  }
  func.func @transform_1(%arg0: i32) -> (i32, i32) {
    %c0_i32 = arith.constant 0 : i32
    %c0_i32_0 = arith.constant 0 : i32
    %c0_i32_1 = arith.constant 0 : i32
    return %c0_i32, %c0_i32_0 : i32, i32
  }
  func.func @transform_2(%arg0: i32) -> (i32, i32) {
    %c0_i32 = arith.constant 0 : i32
    %c0_i32_0 = arith.constant 0 : i32
    %c0_i32_1 = arith.constant 0 : i32
    return %c0_i32, %c0_i32_0 : i32, i32
  }
  func.func @transform_3(%arg0: i32) -> (i32, i32) {
    %c0_i32 = arith.constant 0 : i32
    %c0_i32_0 = arith.constant 0 : i32
    %c0_i32_1 = arith.constant 0 : i32
    return %c0_i32, %c0_i32_0 : i32, i32
  }
  func.func @transform_4(%arg0: i32) -> (i32, i32) {
    %c0_i32 = arith.constant 0 : i32
    %c0_i32_0 = arith.constant 0 : i32
    return %arg0, %c0_i32 : i32, i32
  }
}

</mosaic_0001>

<bundles_post_ra>
// kernel: tpu_custom_call.1
= control target key start
LH: loop header
LB: loop body
LE: loop exit
PB: predicated region body
PF: predicated region fallthrough
CT: control target
= control target key end

     0   :  { %9 = vsyncpa [#allocation3], 0  ;;  %s955_s0 = inlined_call_operand.hbm [shape: f32[16,64], index: 0, kind: input, shape index: {}]   ;;  %s956_s1 = inlined_call_operand.hbm [shape: f32[32,256], index: 1, kind: input, shape index: {}]   ;;  %s957_s2 = inlined_call_operand.hbm [shape: f32[1,256], index: 2, kind: input, shape index: {}]   ;;  %s958_s3 = inlined_call_operand.vmem [shape: f32[1,256], index: 3, kind: input, shape index: {}]   ;;  %s959_s4 = inlined_call_operand.hbm [shape: f32[16,32], index: 4, kind: output, shape index: {}]  }
   0x1   :  { %11 = vsyncpa [#allocation3 + $0x1], 0 }
   0x2   :  { %12 = vsyncpa [#allocation6], 0 }
   0x3   :  { %13 = vsyncpa [#allocation4], 0 }
   0x4   :  { %15 = vsyncpa [#allocation4 + $0x1], 0  ;;  %s789_s15 = smov 0   ;;  %s791_s16 = smov 0  }
   0x5   :  { %s793_s17 = smov 0   ;;  %s795_s18 = smov 0  }
   0x6 LB: > { %s152_s21 = sshll.u32 %s956_s1, 4  ;;  %s813_s22 = sadd.s32 4294967295, %s757_s18   ;;  %s757_s18 = sphi %s795_s18, %s970_s18   ;;  %s753_s17 = sphi %s793_s17, %s969_s17   ;;  %s749_s16 = sphi %s791_s16, %s968_s16   ;;  %s745_s15 = sphi %s789_s15, %s967_s15   ;;  %s153_s21 = int_to_ptr.hbm [resolvable:$true] %s152_s21 }
   0x7   : > { %p494_p0 = scmp.ge.s32.totalorder %s757_s18, 1  ;;  %p42_p1 = scmp.eq.s32.totalorder %s813_s22, 0 }
   0x8   : > { %p141_p2 = scmp.lt.s32.totalorder %s757_s18, 3  ;;  %s759_s24 = smov [#allocation5]  }
   0x9   : > { %s154_s25 = sshll.u32 %s759_s24, 4  ;;  %s167_s28 = sshll.u32 %s957_s2, 4  ;;  %s155_s25 = int_to_ptr.vmem [resolvable:$true] %s154_s25  ;;  %s168_s28 = int_to_ptr.hbm [resolvable:$true] %s167_s28 }
   0xa   : > { %p818_p3 = pnand %p494_p0, %p141_p2  ;;  %s760_s29 = smov [#allocation7]  }
   0xb   : > { %s169_s30 = sshll.u32 %s760_s29, 4  ;;  %s761_s5 = smov 256   ;;  %s170_s30 = int_to_ptr.vmem [resolvable:$true] %s169_s30 }
   0xc   : > { %p525_p4 = pneg %p818_p3  ;;  %s762_s6 = smov 16  }
   0xd   : > { %s493_s7 = sadd.s32 4294967294, %s757_s18   ;;  %s832_s8 = sadd.s32 1, %s757_s18  }
   0xe   : > { %p526_p6 = pnand %p525_p4, %p42_p1  ;;  %s25_s9 = ssub.s32 %s757_s18, %s832_s8 }
   0xf   : > { %s28_s10 = sadd.s32 1, %s753_s17  ;;  %p26_p7 = scmp.eq.s32.totalorder %s25_s9, 0 }
  0x10   : > { %528 = dma.hbm_to_vmem [thread:$0]  (!%p526_p6), %s153_s21, 1024, %s155_s25, [#allocation6], %s761_s5, %s761_s5, %s762_s6  }
  0x11   : > { %531 = dma.hbm_to_vmem [thread:$0]  (!%p526_p6), %s168_s28, 32, %s170_s30, [#allocation6]  }
  0x12   : > { %p35_p8 = scmp.ne.s32.totalorder %s753_s17, %s749_s16  ;;  %p36_p9 = scmp.eq.s32.totalorder %s757_s18, 0 }
  0x13   : > { %p41_p10 = scmp.ne.s32.totalorder %s749_s16, %s745_s15  ;;  %p128_p13 = scmp.eq.s32.totalorder %s813_s22, 1 }
  0x14   : > { %s843_s11 = scalar_select %p26_p7, %s753_s17, %s28_s10  }
  0x15   : > { %p845_p11 = por %p36_p9, %p35_p8  ;;  %p851_p12 = por %p42_p1, %p41_p10 }
  0x16   : > { %p134_p0 = scmp.eq.s32.totalorder %s493_s7, 1  ;;  %p542_p2 = scmp.lt.s32.totalorder %s757_s18, 2 }
  0x17   : > { %s183_s14 = sand.u32 1, %s753_s17   ;;  %p858_p4 = por %p128_p13, %p35_p8 }
  0x18   : > { %p862_p6 = por %p134_p0, %p41_p10  ;;  %s498_s21 = sshll.u32 %s183_s14, 3 }
  0x19   : > { %s499_s24 = sshll.u32 %s757_s18, 3  ;;  %s187_s28 = scalar_lea.vmem [#allocation2], %s498_s21 }
  0x1a   : > { %s191_s27 = scalar_lea.hbm %s955_s0, %s499_s24  ;;  %s195_s29 = sshll.u32 %s187_s28, 4  ;;  %s196_s29 = int_to_ptr.vmem [resolvable:$true] %s195_s29 }
  0x1b   : > { %s193_s30 = sshll.u32 %s191_s27, 4  ;;  %p872_p7 = pnand %p542_p2, %p845_p11  ;;  %s194_s30 = int_to_ptr.hbm [resolvable:$true] %s193_s30 }
  0x1c   : > { %s184_s6 = scalar_lea.sflag [#allocation3], %s183_s14  ;;  %s657_s7 = sshra.s32 %s194_s30, 4  ;;  %s658_s7 = int_to_ptr.hbm [resolvable:$true] %s657_s7 }
  0x1d   : > { %s659_s9 = scalar_lea.hbm %s658_s7, 8  ;;  %p661_p9 = pneg %p872_p7 }
  0x1e   : > { %p660_p8 = scmp.ne.s32.totalorder %s658_s7, %s659_s9  ;;  %s664_s24 = scalar_lea.hbm %s955_s0, 16 }
  0x1f   : > { %p665_p11 = scmp.lt.s32.totalorder %s658_s7, %s955_s0  ;;  %p666_p0 = scmp.lt.s32.totalorder %s664_s24, %s659_s9 }
  0x20   : > { %p662_p10 = pnand %p661_p9, %p660_p8 }
  0x21   : > { %p667_p2 = por %p666_p0, %p665_p11 }
  0x22   : > { %p663_p13 = pneg %p662_p10 }
  0x24   : > { %p668_p5 = pnand %p667_p2, %p663_p13 }
  0x26   : > { %671 = shalt.err (!%p668_p5)
}
  0x27   : > { %535 = dma.hbm_to_vmem [thread:$0]  (!%p872_p7), %s194_s30, 128, %s196_s29, %s184_s6  }
  0x28   : > { %204 = sbr.rel (%p818_p3) target bundleno = 573 (0x23d), region = 36  ;;  %s889_s14 = sand.u32 (!%p818_p3), 1, %s749_s16  }
  0x29   : > { %s501_s26 = sshll.u32 (!%p818_p3), %s889_s14, 3  ;;  %s207_s27 = scalar_lea.sflag (!%p818_p3), [#allocation3], %s889_s14 }
  0x2a   : > { %s210_s28 = scalar_lea.vmem (!%p818_p3), [#allocation2], %s501_s26 }
  0x2d   : > { %732 = dma.done.wait (%p851_p12), %s207_s27, 128  }
  0x2e   : > { %734 = vsyncadd (%p851_p12), %s207_s27, 4294967168 }
  0x2f   : > { %736 = dma.done.wait (%p42_p1), [#allocation6], 1056  }
  0x30   : > { %738 = vsyncadd (%p42_p1), [#allocation6], 4294966240  ;;  %v903_v0 = vld [vmem:[%s210_s28] sm:$0xff]  ;;  %s763_s23 = smov 96   ;;  %v250_v3 = vld [vmem:[#allocation5 + $0x20] sm:$0xff]  ;;  %vm262_vm0 = vcmask 261120  }
  0x31   : > { %v252_v1 = vld [vmem:[#allocation5 + $0x30] sm:$0xff]  ;;  %v253_v2 = vld [vmem:[#allocation5 + $0x38] sm:$0xff]  ;;  %318 = vrot.lane.b32.xlu0 %v903_v0, %s763_s23  ;;  %v251_v4 = vld [vmem:[#allocation5 + $0x28] sm:$0xff]  ;;  %s510_s30 = sshll.u32 %s813_s22, 3  ;;  %s245_s9 = scalar_lea.vmem [#allocation8], %s501_s26 }
  0x32   : > { %334 = vmatpush.msra.mxu2 %v252_v1  ;;  %354 = vmatpush.msra.mxu3 %v253_v2  ;;  %v248_v5 = vld [vmem:[#allocation5 + $0x10] sm:$0xff]  ;;  %v249_v6 = vld [vmem:[#allocation5 + $0x18] sm:$0xff]  ;;  %v246_v7 = vld [vmem:[#allocation5] sm:$0xff]  ;;  %s399_s7 = scalar_lea.hbm %s959_s4, %s510_s30  ;;  %s401_s10 = sshll.u32 %s245_s9, 4  ;;  %s402_s10 = int_to_ptr.vmem [resolvable:$true] %s401_s10 }
  0x33   : > { %278 = vmatpush.msra.mxu0 %v252_v1  ;;  %298 = vmatpush.msra.mxu1 %v253_v2  ;;  %v247_v8 = vld [vmem:[#allocation5 + $0x8] sm:$0xff]  ;;  %v254_v10 = vld [vmem:[#allocation7] sm:$0x3]  ;;  %v255_v17 = vld [vmem:[%s958_s3] sm:$0x3]  ;;  %s403_s21 = sshll.u32 %s399_s7, 4  ;;  %s404_s21 = int_to_ptr.hbm [resolvable:$true] %s403_s21 }
  0x34   : > { %335 = vmatpush.msra.mxu2 %v250_v3  ;;  %355 = vmatpush.msra.mxu3 %v251_v4  ;;  %v258_v11 = vperm.slane %v254_v10, 0  ;;  %v259_v12 = vperm.slane %v254_v10, 1  ;;  %v309_v19 = vperm.slane %v255_v17, 0  ;;  %v310_v20 = vperm.slane %v255_v17, 1  ;;  %s389_s24 = scalar_lea.sflag [#allocation4], %s889_s14  ;;  %s701_s25 = sshra.s32 %s404_s21, 4  ;;  %s702_s25 = int_to_ptr.hbm [resolvable:$true] %s701_s25 }
  0x35   : > { %279 = vmatpush.msra.mxu0 %v250_v3  ;;  %299 = vmatpush.msra.mxu1 %v251_v4  ;;  %s703_s22 = scalar_lea.hbm %s702_s25, 8  ;;  %s707_s27 = scalar_lea.hbm %s959_s4, 16 }
  0x36   : > { %336 = vmatpush.msra.mxu2 %v248_v5  ;;  %356 = vmatpush.msra.mxu3 %v249_v6  ;;  %p704_p1 = scmp.ne.s32.totalorder %s702_s25, %s703_s22  ;;  %p708_p12 = scmp.lt.s32.totalorder %s702_s25, %s959_s4 }
  0x37   : > { %280 = vmatpush.msra.mxu0 %v248_v5  ;;  %300 = vmatpush.msra.mxu1 %v249_v6  ;;  %p709_p7 = scmp.lt.s32.totalorder %s707_s27, %s703_s22 }
  0x38   : > { %337 = vmatpush.msra.mxu2 %v246_v7  ;;  %357 = vmatpush.msra.mxu3 %v247_v8  ;;  %p705_p3 = pnand %p704_p1, %p858_p4 }
  0x39   : > { %281 = vmatpush.msra.mxu0 %v246_v7  ;;  %301 = vmatpush.msra.mxu1 %v247_v8  ;;  %p710_p8 = por %p709_p7, %p708_p12 }
  0x3a   : > { %505 = vmatmul.msk.f32.vlgmr.msra.gmra.mxu0 %vm262_vm0, %v903_v0  ;;  %506 = vmatmul.msk.f32.vlgmr.msra.gmra.mxu1 %vm262_vm0, %v903_v0  ;;  %p706_p5 = pneg %p705_p3 }
  0x3c   : > { %p711_p9 = pnand %p710_p8, %p706_p5 }
  0xa3   : > { %v319_v9 = vpop.permute.xlu0 %318 }
  0xa4   : > { %507 = vmatmul.msk.f32.vlgmr.msra.gmra.mxu2 %vm262_vm0, %v319_v9  ;;  %508 = vmatmul.msk.f32.vlgmr.msra.gmra.mxu3 %vm262_vm0, %v319_v9 }
  0xb7   : > { %v283_v13 = vpop.f32.mrf.mxu0  ;;  %v303_v14 = vpop.f32.mrf.mxu1 }
  0xb8   : > { %v284_v15 = vadd.f32 %v283_v13, %v258_v11  ;;  %v304_v16 = vadd.f32 %v303_v14, %v259_v12 }
  0xba   : > { %583 = vtanh.f32 %v284_v15 }
  0xbb   : > { %585 = vtanh.f32 %v304_v16 }
  0xc0   : > { %v584_v18 = vpop.eup %583 }
  0xc1   : > { %v586_v21 = vpop.eup %585  ;;  %v313_v22 = vmul.f32 %v584_v18, %v309_v19 }
  0xc2   : > { %v314_v23 = vmul.f32 %v586_v21, %v310_v20 }
  0xc4   : > { %v315_v24 = vadd.f32 %v314_v23, %v313_v22 }
  0xc6   : > { %316 = vadd.xlane.f32.xlu0 %v315_v24 }
 0x127   : > { %v339_v25 = vpop.f32.mrf.mxu2  ;;  %v359_v26 = vpop.f32.mrf.mxu3 }
 0x128   : > { %v340_v27 = vadd.f32 %v339_v25, %v258_v11  ;;  %v360_v28 = vadd.f32 %v359_v26, %v259_v12 }
 0x12a   : > { %587 = vtanh.f32 %v340_v27 }
 0x12b   : > { %589 = vtanh.f32 %v360_v28 }
 0x130   : > { %v588_v29 = vpop.eup %587 }
 0x131   : > { %v590_v30 = vpop.eup %589  ;;  %v364_v31 = vmul.f32 %v588_v29, %v309_v19 }
 0x132   : > { %v365_v32 = vmul.f32 %v590_v30, %v310_v20 }
 0x134   : > { %v366_v33 = vadd.f32 %v365_v32, %v364_v31 }
 0x136   : > { %367 = vadd.xlane.f32.xlu1 %v366_v33 }
 0x139   : > { %v317_v34 = vpop.xlane.xlu0 %316 }
 0x1a9   : > { %v368_v35 = vpop.xlane.xlu1 %367 }
 0x1aa   : > { %v369_v36 = vmax.f32 %v317_v34, %v368_v35 }
 0x1ac   : > { %v370_v37 = vsub.f32 %v317_v34, %v369_v36  ;;  %v373_v38 = vsub.f32 %v368_v35, %v369_v36 }
 0x1ae   : > { %v371_v39 = vmul.f32 1.442695, %v370_v37  ;;  %v374_v40 = vmul.f32 1.442695, %v373_v38 }
 0x1b0   : > { %591 = vpow2.f32 %v371_v39 }
 0x1b1   : > { %593 = vpow2.f32 %v374_v40 }
 0x1b6   : > { %v592_v41 = vpop.eup %591 }
 0x1b7   : > { %v594_v42 = vpop.eup %593 }
 0x1b8   : > { %v376_v43 = vadd.f32 %v594_v42, %v592_v41 }
 0x1ba   : > { %595 = vrcp.f32 %v376_v43 }
 0x1c0   : > { %v596_v44 = vpop.eup %595 }
 0x1c1   : > { %v380_v45 = vmul.f32 %v596_v44, %v594_v42  ;;  %v378_v46 = vmul.f32 %v596_v44, %v592_v41 }
 0x1c3   : > { %v381_v47 = vmul.f32 %v380_v45, %v903_v0  ;;  %v379_v48 = vmul.f32 %v378_v46, %v903_v0 }
 0x1c5   : > { %383 = vrot.lane.b32.xlu1 %v381_v47, %s763_s23 }
 0x237   : > { %v384_v49 = vpop.permute.xlu1 %383 }
 0x238   : > { %v386_v50 = vadd.f32 %v384_v49, %v379_v48 }
 0x23a   : > { %387 = vst.msk [vmem:[%s245_s9] sm:$0xff] %vm262_vm0, %v386_v50 }
 0x23b   : > { %714 = shalt.err (!%p711_p9)
}
 0x23c   : > { %523 = dma.vmem_to_hbm [thread:$0]  (%p858_p4), %s402_s10, 128, %s404_s21, %s389_s24  }
 0x23d PF: > { %s415_s14 = sand.u32 1, %s745_s15   ;;  %p966_p10 = scmp.ge.s32.totalorder %s757_s18, 2 }
 0x23e   : > { %s416_s13 = scalar_lea.sflag [#allocation4], %s415_s14 }
 0x23f   : > { %p537_p13 = pnand %p966_p10, %p862_p6 }
 0x241   : > { %p538_p11 = pneg %p537_p13 }
 0x243   : > { %740 = dma.done.wait (%p538_p11), %s416_s13, 128  }
 0x244   : > { %742 = vsyncadd (%p538_p11), %s416_s13, 4294967168  ;;  %p18_p0 = scmp.ge.s32.totalorder %s832_s8, 4   ;;  %s967_s15 = smov %s749_s16 }
 0x245   : > { %s968_s16 = smov %s753_s17  ;;  %s969_s17 = smov %s843_s11 }
 0x246   : > { %s970_s18 = smov %s832_s8  ;;  %20 = sbr.rel (!%p18_p0) target bundleno = 6 (0x6), region = 89 }
 0x24b   :  { %422 = vsyncpa [#allocation3], 1 }
 0x24c   :  { %424 = vsyncpa [#allocation3 + $0x1], 1 }
 0x24d   :  { %425 = vsyncpa [#allocation6], 1 }
 0x24e   :  { %426 = vsyncpa [#allocation4], 1 }
 0x24f   :  { %428 = vsyncpa [#allocation4 + $0x1], 1 }

</bundles_post_ra>
